<compile_context>
chip_gen: v7x
topology: tpu7x:2x2x1
jax: 0.10.0
libtpu: 0.0.40
codegen_flags: <defaults>
</compile_context>

<pallas_src>
import numpy as np
import jax
import jax.numpy as jnp
from jax import lax
from jax.experimental import pallas as pl
from jax.experimental.pallas import tpu as pltpu

ALPHA = 0.01  # LeakyReLU slope used by MAGNN_mptype_layer


def _round_up(x, m):
    return (x + m - 1) // m * m


# ------------------------------------------------------------------------------
# Kernel A: per-metapath-instance RotatE encoder + fused attention logits
#   inputs (per edge tile): er/ei (TE, L*Dh), rotation rr/ri (1, L*Dh),
#                           fused attention weights (H, 2D)
#   outputs: hid (TE, D) = [mean real | mean imag], logits aT (H, TE) (lane-dense)
# ------------------------------------------------------------------------------
def _make_mp_encoder_kernel(L, Dh):
    inv_L = 1.0 / L

    def kernel(er_ref, ei_ref, rr_ref, ri_ref, wf_ref, hid_ref, aT_ref):
        er = er_ref[...]                       # (TE, L*Dh)
        ei = ei_ref[...]
        rr = rr_ref[...]                       # (1, L*Dh) broadcast over edges
        ri = ri_ref[...]
        # RotatE rotation as one wide elementwise pass (lane dim = L*Dh).
        rot_r = er * rr - ei * ri
        rot_i = er * ri + ei * rr
        # mean over the L metapath positions via static lane slices.
        hr = rot_r[:, 0:Dh]
        hi = rot_i[:, 0:Dh]
        for l in range(1, L):
            hr = hr + rot_r[:, l * Dh:(l + 1) * Dh]
            hi = hi + rot_i[:, l * Dh:(l + 1) * Dh]
        hr = hr * inv_L
        hi = hi * inv_L
        # center node features = last metapath position (no duplicate input).
        er_last = er[:, (L - 1) * Dh:L * Dh]
        ei_last = ei[:, (L - 1) * Dh:L * Dh]
        # fused attn1 + attn2 projection: single matmul, emitted transposed (H, TE)
        # so the logits store is lane-dense and Kernel B needs no transpose.
        x = jnp.concatenate([hr, hi, er_last, ei_last], axis=1)        # (TE, 2D)
        s = lax.dot_general(wf_ref[...], x, (((1,), (1,)), ((), ())),
                            preferred_element_type=jnp.float32)        # (H, TE)
        aT_ref[...] = jnp.where(s > 0, s, ALPHA * s)                   # LeakyReLU
        hid_ref[...] = jnp.concatenate([hr, hi], axis=1)               # (TE, D)

    return kernel


def mp_encode(er, ei, rot_re, rot_im, w_fused, L, Dh, tile_e):
    E_pad = er.shape[0]
    D = 2 * Dh
    H = w_fused.shape[0]
    grid = (E_pad // tile_e,)
    return pl.pallas_call(
        _make_mp_encoder_kernel(L, Dh),
        out_shape=(jax.ShapeDtypeStruct((E_pad, D), jnp.float32),
                   jax.ShapeDtypeStruct((H, E_pad), jnp.float32)),
        grid=grid,
        in_specs=[
            pl.BlockSpec((tile_e, L * Dh), lambda i: (i, 0)),
            pl.BlockSpec((tile_e, L * Dh), lambda i: (i, 0)),
            pl.BlockSpec((1, L * Dh), lambda i: (0, 0)),
            pl.BlockSpec((1, L * Dh), lambda i: (0, 0)),
            pl.BlockSpec((H, 2 * D), lambda i: (0, 0)),
        ],
        out_specs=(
            pl.BlockSpec((tile_e, D), lambda i: (i, 0)),
            pl.BlockSpec((H, tile_e), lambda i: (0, i)),
        ),
        compiler_params=pltpu.CompilerParams(
            dimension_semantics=("parallel",)),
    )(er, ei, rot_re, rot_im, w_fused)


# ------------------------------------------------------------------------------
# Kernel B: per-destination edge softmax + weighted sum aggregation (+ fused ELU)
#   aT: (H, E) logits, dst: (1, E) int32 destinations, hid: (E, D) [re|im]
#   out: (N, H*D) lane-dense; mask built on-chip from dst, tiled over N.
# ------------------------------------------------------------------------------
def _edge_softmax_agg_kernel(aT_ref, dst_ref, hid_ref, out_ref):
    tn = out_ref.shape[0]
    E = dst_ref.shape[1]
    H = aT_ref.shape[0]
    node_base = pl.program_id(0) * tn
    row_ids = lax.broadcasted_iota(jnp.int32, (tn, E), 0) + node_base
    mask = row_ids == dst_ref[...]                       # (tn, E), built on-chip
    hid = hid_ref[...]                                   # (E, D)
    NEG = jnp.float32(-1e30)
    aggs = []
    for h in range(H):                                   # nhead is small & static
        a_row = aT_ref[h:h + 1, :]                       # (1, E)
        masked = jnp.where(mask, a_row, NEG)
        m = jnp.max(masked, axis=1, keepdims=True)       # per-destination max
        p = jnp.exp(jnp.where(mask, a_row - m, NEG))     # zero where mask==False
        denom = jnp.sum(p, axis=1, keepdims=True)
        denom = jnp.where(denom == 0.0, 1.0, denom)      # isolated / padded rows
        w = p * pl.reciprocal(denom, approx=True)        # EUP reciprocal
        aggs.append(jnp.dot(w, hid, preferred_element_type=jnp.float32))
    agg = jnp.concatenate(aggs, axis=1)                  # (tn, H*D) lane-dense
    out_ref[...] = jnp.where(agg > 0, agg, jnp.exp(agg) - 1.0)   # fused ELU
    # TODO(synk): for very large E, tile E as well with an online (flash-style)
    #             softmax accumulator instead of keeping the full (E, D) resident.


def edge_softmax_agg(aT, dst_row, hid, N_pad, tn):
    H, E_pad = aT.shape
    D = hid.shape[1]
    grid = (N_pad // tn,)
    return pl.pallas_call(
        _edge_softmax_agg_kernel,
        out_shape=jax.ShapeDtypeStruct((N_pad, H * D), jnp.float32),
        grid=grid,
        in_specs=[
            pl.BlockSpec((H, E_pad), lambda i: (0, 0)),
            pl.BlockSpec((1, E_pad), lambda i: (0, 0)),
            pl.BlockSpec((E_pad, D), lambda i: (0, 0)),
        ],
        out_specs=pl.BlockSpec((tn, H * D), lambda i: (i, 0)),
        compiler_params=pltpu.CompilerParams(
            dimension_semantics=("parallel",),
            vmem_limit_bytes=32 * 1024 * 1024),   # re-derived for v7x's 64 MiB VMEM
    )(aT, dst_row, hid)


# ------------------------------------------------------------------------------
# Kernel C: semantic (metapath-type) attention of MAGNN_ntype_layer
#   feats: (M, Nt, F), w1: (F, A), b1: (1, A), w2: (A, 1) -> out (Nt, F)
# ------------------------------------------------------------------------------
def _semantic_attention_kernel(feats_ref, w1_ref, b1_ref, w2_ref, out_ref):
    M = feats_ref.shape[0]
    Nt = feats_ref.shape[1]
    w1 = w1_ref[...]
    b1 = b1_ref[...]
    w2 = w2_ref[...]
    inv_nt = 1.0 / Nt
    logits = []
    # TODO(synk): for large M*Nt, flatten to one (M*Nt_pad, F) matmul (with Nt
    #             padded to a sublane multiple and padded rows masked out).
    for m in range(M):                                   # M (#metapath types) small
        f = feats_ref[m]                                                 # (Nt, F)
        h1 = jnp.tanh(jnp.dot(f, w1, preferred_element_type=jnp.float32) + b1)
        mean1 = jnp.sum(h1, axis=0, keepdims=True) * inv_nt              # (1, A)
        logits.append(jnp.dot(mean1, w2, preferred_element_type=jnp.float32))
    lcat = jnp.concatenate(logits, axis=0)                               # (M, 1)
    mx = jnp.max(lcat, axis=0, keepdims=True)
    ex = jnp.exp(lcat - mx)
    beta = ex / jnp.sum(ex, axis=0, keepdims=True)                       # (M, 1)
    acc = feats_ref[0] * beta[0:1, 0:1]
    for m in range(1, M):
        acc = acc + feats_ref[m] * beta[m:m + 1, 0:1]
    out_ref[...] = acc


# ------------------------------------------------------------------------------
# Glue (plain JAX): parameter prep, final_rvec recursion, gather, padding.
# ------------------------------------------------------------------------------
def compute_final_rvec(rvec, etypes, L, odim):
    """RotatE0 rotation schedule: returns (rot_re, rot_im), each (L, odim//2)."""
    Dh = odim // 2
    norm = jnp.maximum(jnp.linalg.norm(rvec, axis=2, keepdims=True), 1e-12)
    r = rvec / norm                                    # F.normalize(rvec, p=2, dim=2)
    rd = jnp.stack([r, r], axis=1)                     # (R, 2, Dh, 2)
    rd = rd.at[:, 1, :, 1].multiply(-1.0)              # conjugate for odd etypes
    rd = rd.reshape(rvec.shape[0] * 2, Dh, 2)
    final = [None] * L
    final[L - 1] = jnp.stack([jnp.ones((Dh,), jnp.float32),
                              jnp.zeros((Dh,), jnp.float32)], axis=-1)
    for i in range(L - 2, -1, -1):
        if etypes[i] is not None:
            rv = rd[etypes[i]]
            re = final[i + 1][:, 0] * rv[:, 0] - final[i + 1][:, 1] * rv[:, 1]
            im = final[i + 1][:, 0] * rv[:, 1] + final[i + 1][:, 1] * rv[:, 0]
            final[i] = jnp.stack([re, im], axis=-1)
        else:
            final[i] = final[i + 1]
    fr = jnp.stack(final, axis=0)                      # (L, Dh, 2)
    return fr[:, :, 0], fr[:, :, 1]


def magnn_mptype_forward(params, etypes, mpinstances, iftargets, node_feats,
                         nhead, odim):
    mpinstances = jnp.asarray(mpinstances)
    E, L = mpinstances.shape
    D = odim
    Dh = D // 2
    N = node_feats.shape[0]

    # large edge tiles (amortize per-grid-step overhead); pad E instead of asserting.
    if E >= 512:
        tile_e = 512
        E_pad = _round_up(E, tile_e)
    else:
        tile_e = E_pad = _round_up(E, 8)
    # node tiles for the softmax/aggregation kernel.
    if N >= 256:
        tn = 256
        N_pad = _round_up(N, tn)
    else:
        tn = N_pad = _round_up(N, 8)

    # TODO(synk): the gather below still materializes (E, L, D) via XLA; fusing it
    #             into Kernel A (scalar-prefetched mpinstances) would halve the
    #             dominant edata HBM traffic.
    edata = node_feats[mpinstances]                    # (E, L, D)
    ed = edata.reshape(E, L, Dh, 2)
    er = ed[..., 0].reshape(E, L * Dh)                 # real plane, flattened
    ei = ed[..., 1].reshape(E, L * Dh)                 # imag plane, flattened
    if E_pad != E:
        er = jnp.pad(er, ((0, E_pad - E), (0, 0)))
        ei = jnp.pad(ei, ((0, E_pad - E), (0, 0)))

    rot_re, rot_im = compute_final_rvec(params['rvec'], etypes, L, odim)
    rot_re = rot_re.reshape(1, L * Dh)
    rot_im = rot_im.reshape(1, L * Dh)

    # fused [attn2 | attn1] weights, de-interleaved to match x = [hr|hi|cr|ci].
    attn1_w = params['attn1_w']                        # (H, D)
    attn2 = params['attn2'][0]                         # (H, D)
    w_fused = jnp.concatenate([attn2[:, 0::2], attn2[:, 1::2],
                               attn1_w[:, 0::2], attn1_w[:, 1::2]], axis=1)  # (H, 2D)

    hid, aT = mp_encode(er, ei, rot_re, rot_im, w_fused, L, Dh, tile_e)

    # destinations only (no dense (N, E) mask in HBM); pad with -1 (never matches).
    dst = mpinstances[:, -1].astype(jnp.int32)
    dst = jnp.pad(dst, (0, E_pad - E), constant_values=-1)[None, :]   # (1, E_pad)

    ft = edge_softmax_agg(aT, dst, hid, N_pad, tn)     # (N_pad, H*D), ELU applied

    ift = np.asarray(iftargets)
    targets = np.where(ift[:, 1] == 1)[0]
    nt = len(targets)
    # re-interleave [re|im] planes back to the canonical per-head ordering,
    # only on the small target slice.
    ft_t = ft[jnp.asarray(targets)].reshape(nt, nhead, 2, Dh)
    ft_t = jnp.stack([ft_t[:, :, 0, :], ft_t[:, :, 1, :]], axis=-1)
    ft_t = ft_t.reshape(nt, nhead * D)
    return ift[targets, 0], ft_t


def magnn_ntype_forward(params, mptype_etypes, mptype_mpinstances, mptype_iftargets,
                        node_feats, nhead, odim, adim):
    outs = []
    targets = None
    for mptype in mptype_iftargets:
        targets, feats = magnn_mptype_forward(
            params, mptype_etypes[mptype], mptype_mpinstances[mptype],
            mptype_iftargets[mptype], node_feats, nhead, odim)
        outs.append(feats)                             # ELU already applied in kernel B
    feats_stacked = jnp.stack(outs, axis=0)            # (M, Nt, nhead*odim)
    out = pl.pallas_call(
        _semantic_attention_kernel,
        out_shape=jax.ShapeDtypeStruct(feats_stacked.shape[1:], jnp.float32),
        in_specs=[pl.BlockSpec(memory_space=pltpu.MemorySpace.VMEM)] * 4,
        out_specs=pl.BlockSpec(memory_space=pltpu.MemorySpace.VMEM),
        compiler_params=pltpu.CompilerParams(vmem_limit_bytes=32 * 1024 * 1024),
    )(feats_stacked, params['fc1_w'].T, params['fc1_b'][None, :], params['fc2_w'].T)
    return targets, out


# ------------------------------------------------------------------------------
# Pure-JAX reference (mirrors the PyTorch forward) for verification.
# ------------------------------------------------------------------------------
def reference_forward(params, mptype_etypes, mptype_mpinstances, mptype_iftargets,
                      node_feats, nhead, odim, adim):
    N = node_feats.shape[0]
    outs, targets = [], None
    for mptype in mptype_iftargets:
        etypes = mptype_etypes[mptype]
        mpinst = mptype_mpinstances[mptype]
        ift = np.asarray(mptype_iftargets[mptype])
        E, L = mpinst.shape
        D, Dh = odim, odim // 2
        edata = node_feats[mpinst]
        center = edata[:, -1]
        rot_re, rot_im = compute_final_rvec(params['rvec'], etypes, L, odim)
        ed = edata.reshape(E, L, Dh, 2)
        er, ei = ed[..., 0], ed[..., 1]
        nr = er * rot_re[None] - ei * rot_im[None]
        ni = er * rot_im[None] + ei * rot_re[None]
        hidden = jnp.mean(jnp.stack([nr, ni], axis=-1).reshape(E, L, D), axis=1)
        a1 = center @ params['attn1_w'].T
        a2 = hidden @ params['attn2'][0].T
        s = a1 + a2
        a = jnp.where(s > 0, s, ALPHA * s)
        dst = mpinst[:, -1]
        m = jax.ops.segment_max(a, dst, num_segments=N)
        ex = jnp.exp(a - m[dst])
        denom = jax.ops.segment_sum(ex, dst, num_segments=N)
        w = ex / denom[dst]
        ft = jax.ops.segment_sum(w[:, :, None] * hidden[:, None, :], dst,
                                 num_segments=N)
        tgt = np.where(ift[:, 1] == 1)[0]
        outs.append(jax.nn.elu(ft[tgt]).reshape(len(tgt), nhead * D))
        targets = ift[tgt, 0]
    betas = []
    for each in outs:
        fc1 = jnp.tanh(each @ params['fc1_w'].T + params['fc1_b'])
        betas.append(jnp.mean(fc1, axis=0) @ params['fc2_w'].T)
    beta = jax.nn.softmax(jnp.concatenate(betas, axis=0), axis=0)
    stacked = jnp.stack(outs, axis=0)
    out = jnp.sum(beta[:, None, None] * stacked, axis=0)
    return targets, out


# ------------------------------------------------------------------------------
if __name__ == "__main__":
    odim, nhead, adim = 32, 4, 16
    num_etypes, L, N, E = 2, 3, 12, 16
    n_targets = 6

    key = jax.random.PRNGKey(0)
    keys = jax.random.split(key, 12)

    def xavier(k, shape, fan_in, fan_out, gain=1.414):
        std = gain * (2.0 / (fan_in + fan_out)) ** 0.5
        return std * jax.random.normal(k, shape, dtype=jnp.float32)

    params = {
        'rvec': jax.random.normal(keys[0], (num_etypes, odim // 2, 2),
                                  dtype=jnp.float32),
        'attn1_w': xavier(keys[1], (nhead, odim), odim, nhead),
        'attn2': xavier(keys[2], (1, nhead, odim), odim, nhead),
        'fc1_w': xavier(keys[3], (adim, odim * nhead), odim * nhead, adim),
        'fc1_b': jnp.zeros((adim,), jnp.float32),
        'fc2_w': xavier(keys[4], (1, adim), adim, 1),
    }

    # two metapath types; etypes index the RotatE0-doubled relation vectors
    mptype_etypes = {'mp0': [0, 2], 'mp1': [1, None]}

    node_feats = jax.random.normal(keys[5], (N, odim), dtype=jnp.float32)

    mp0 = np.array(jax.random.randint(keys[6], (E, L), 0, N))
    mp0[:, -1] = np.array(jax.random.randint(keys[7], (E,), 0, n_targets))
    mp1 = np.array(jax.random.randint(keys[8], (E, L), 0, N))
    mp1[:, -1] = np.array(jax.random.randint(keys[9], (E,), 0, n_targets))
    mptype_mpinstances = {'mp0': jnp.array(mp0), 'mp1': jnp.array(mp1)}

    iftargets = np.stack([100 + np.arange(N),
                          (np.arange(N) < n_targets).astype(np.int64)], axis=1)
    mptype_iftargets = {'mp0': iftargets, 'mp1': iftargets}

    t_k, out_k = magnn_ntype_forward(params, mptype_etypes, mptype_mpinstances,
                                     mptype_iftargets, node_feats, nhead, odim, adim)
    out_k = jax.block_until_ready(out_k)

    t_r, out_r = reference_forward(params, mptype_etypes, mptype_mpinstances,
                                   mptype_iftargets, node_feats, nhead, odim, adim)

    # tolerance loosened slightly vs f32-exact because the edge-softmax uses the
    # EUP approximate reciprocal (pl.reciprocal(approx=True)).
    np.testing.assert_allclose(np.asarray(out_k), np.asarray(out_r),
                               rtol=5e-3, atol=5e-3)
    assert np.array_equal(np.asarray(t_k), np.asarray(t_r))
    print("KERNEL_OK")
</pallas_src>

<mosaic_0001>
module attributes {stable_mosaic.version = 11 : i64} {
  func.func @kernel(%arg0: i32, %arg1: memref<16x48xf32, #tpu.memory_space<vmem>>, %arg2: memref<16x48xf32, #tpu.memory_space<vmem>>, %arg3: memref<1x48xf32, #tpu.memory_space<vmem>>, %arg4: memref<1x48xf32, #tpu.memory_space<vmem>>, %arg5: memref<4x64xf32, #tpu.memory_space<vmem>>, %arg6: memref<16x32xf32, #tpu.memory_space<vmem>>, %arg7: memref<4x16xf32, #tpu.memory_space<vmem>>) attributes {dimension_semantics = [#tpu.dimension_semantics<parallel>], iteration_bounds = array<i64: 1>, scalar_prefetch = 0 : i64, scratch_operands = 0 : i64, tpu.core_type = #tpu.core_type<tc>, window_params = [{transform_indices = @transform_0, window_bounds = array<i64: 16, 48>}, {transform_indices = @transform_1, window_bounds = array<i64: 16, 48>}, {pipeline_mode = #tpu.pipeline_mode<synchronous>, transform_indices = @transform_2, window_bounds = array<i64: 1, 48>}, {pipeline_mode = #tpu.pipeline_mode<synchronous>, transform_indices = @transform_3, window_bounds = array<i64: 1, 48>}, {pipeline_mode = #tpu.pipeline_mode<synchronous>, transform_indices = @transform_4, window_bounds = array<i64: 4, 64>}, {transform_indices = @transform_5, window_bounds = array<i64: 16, 32>}, {transform_indices = @transform_6, window_bounds = array<i64: 4, 16>}]} {
    %c0 = arith.constant 0 : index
    %c0_0 = arith.constant 0 : index
    %0 = vector.load %arg1[%c0, %c0_0] : memref<16x48xf32, #tpu.memory_space<vmem>>, vector<16x48xf32>
    %c0_1 = arith.constant 0 : index
    %c0_2 = arith.constant 0 : index
    %1 = vector.load %arg2[%c0_1, %c0_2] : memref<16x48xf32, #tpu.memory_space<vmem>>, vector<16x48xf32>
    %c0_3 = arith.constant 0 : index
    %c0_4 = arith.constant 0 : index
    %2 = vector.load %arg3[%c0_3, %c0_4] : memref<1x48xf32, #tpu.memory_space<vmem>>, vector<1x48xf32>
    %c0_5 = arith.constant 0 : index
    %c0_6 = arith.constant 0 : index
    %3 = vector.load %arg4[%c0_5, %c0_6] : memref<1x48xf32, #tpu.memory_space<vmem>>, vector<1x48xf32>
    %4 = vector.broadcast %2 : vector<1x48xf32> to vector<16x48xf32>
    %5 = arith.mulf %0, %4 : vector<16x48xf32>
    %6 = vector.broadcast %3 : vector<1x48xf32> to vector<16x48xf32>
    %7 = arith.mulf %1, %6 : vector<16x48xf32>
    %8 = arith.subf %5, %7 : vector<16x48xf32>
    %9 = vector.broadcast %3 : vector<1x48xf32> to vector<16x48xf32>
    %10 = arith.mulf %0, %9 : vector<16x48xf32>
    %11 = vector.broadcast %2 : vector<1x48xf32> to vector<16x48xf32>
    %12 = arith.mulf %1, %11 : vector<16x48xf32>
    %13 = arith.addf %10, %12 : vector<16x48xf32>
    %14 = vector.extract_strided_slice %8 {offsets = [0, 0], sizes = [16, 16], strides = [1, 1]} : vector<16x48xf32> to vector<16x16xf32>
    %15 = vector.extract_strided_slice %13 {offsets = [0, 0], sizes = [16, 16], strides = [1, 1]} : vector<16x48xf32> to vector<16x16xf32>
    %16 = vector.extract_strided_slice %8 {offsets = [0, 16], sizes = [16, 16], strides = [1, 1]} : vector<16x48xf32> to vector<16x16xf32>
    %17 = arith.addf %14, %16 : vector<16x16xf32>
    %18 = vector.extract_strided_slice %13 {offsets = [0, 16], sizes = [16, 16], strides = [1, 1]} : vector<16x48xf32> to vector<16x16xf32>
    %19 = arith.addf %15, %18 : vector<16x16xf32>
    %20 = vector.extract_strided_slice %8 {offsets = [0, 32], sizes = [16, 16], strides = [1, 1]} : vector<16x48xf32> to vector<16x16xf32>
    %21 = arith.addf %17, %20 : vector<16x16xf32>
    %22 = vector.extract_strided_slice %13 {offsets = [0, 32], sizes = [16, 16], strides = [1, 1]} : vector<16x48xf32> to vector<16x16xf32>
    %23 = arith.addf %19, %22 : vector<16x16xf32>
    %cst = arith.constant 0.333333343 : f32
    %24 = vector.broadcast %cst : f32 to vector<16x16xf32>
    %25 = arith.mulf %21, %24 : vector<16x16xf32>
    %cst_7 = arith.constant 0.333333343 : f32
    %26 = vector.broadcast %cst_7 : f32 to vector<16x16xf32>
    %27 = arith.mulf %23, %26 : vector<16x16xf32>
    %28 = vector.extract_strided_slice %0 {offsets = [0, 32], sizes = [16, 16], strides = [1, 1]} : vector<16x48xf32> to vector<16x16xf32>
    %29 = vector.extract_strided_slice %1 {offsets = [0, 32], sizes = [16, 16], strides = [1, 1]} : vector<16x48xf32> to vector<16x16xf32>
    %30 = tpu.concatenate %25, %27, %28, %29 in 1 : vector<16x16xf32>, vector<16x16xf32>, vector<16x16xf32>, vector<16x16xf32> -> vector<16x64xf32>
    %c0_8 = arith.constant 0 : index
    %c0_9 = arith.constant 0 : index
    %31 = vector.load %arg5[%c0_8, %c0_9] : memref<4x64xf32, #tpu.memory_space<vmem>>, vector<4x64xf32>
    %cst_10 = arith.constant dense<0.000000e+00> : vector<4x16xf32>
    %32 = tpu.matmul %31, %30, %cst_10 {dimension_numbers = #tpu.dot_dimension_numbers<[1], [1], [0], [0], [0, 0, 1, 0], [], []>} : vector<4x64xf32>, vector<16x64xf32>, vector<4x16xf32> -> vector<4x16xf32>
    %cst_11 = arith.constant 0.000000e+00 : f32
    %33 = vector.broadcast %cst_11 : f32 to vector<4x16xf32>
    %34 = arith.cmpf ogt, %32, %33 : vector<4x16xf32>
    %cst_12 = arith.constant 0.00999999977 : f32
    %35 = vector.broadcast %cst_12 : f32 to vector<4x16xf32>
    %36 = arith.mulf %35, %32 : vector<4x16xf32>
    %37 = arith.select %34, %32, %36 : vector<4x16xi1>, vector<4x16xf32>
    %c0_13 = arith.constant 0 : index
    %c0_14 = arith.constant 0 : index
    %38 = vector.load %arg7[%c0_13, %c0_14] : memref<4x16xf32, #tpu.memory_space<vmem>>, vector<4x16xf32>
    tpu.vector_store %arg7[%c0_13, %c0_14], %37 {strides = array<i32>} : memref<4x16xf32, #tpu.memory_space<vmem>>, vector<4x16xf32>,
    %39 = tpu.concatenate %25, %27 in 1 : vector<16x16xf32>, vector<16x16xf32> -> vector<16x32xf32>
    %c0_15 = arith.constant 0 : index
    %c0_16 = arith.constant 0 : index
    %40 = vector.load %arg6[%c0_15, %c0_16] : memref<16x32xf32, #tpu.memory_space<vmem>>, vector<16x32xf32>
    tpu.vector_store %arg6[%c0_15, %c0_16], %39 {strides = array<i32>} : memref<16x32xf32, #tpu.memory_space<vmem>>, vector<16x32xf32>,
    return
  }
  func.func @transform_0(%arg0: i32) -> (i32, i32) {
    %c0_i32 = arith.constant 0 : i32
    %c0_i32_0 = arith.constant 0 : i32
    return %arg0, %c0_i32 : i32, i32
  }
  func.func @transform_1(%arg0: i32) -> (i32, i32) {
    %c0_i32 = arith.constant 0 : i32
    %c0_i32_0 = arith.constant 0 : i32
    return %arg0, %c0_i32 : i32, i32
  }
  func.func @transform_2(%arg0: i32) -> (i32, i32) {
    %c0_i32 = arith.constant 0 : i32
    %c0_i32_0 = arith.constant 0 : i32
    %c0_i32_1 = arith.constant 0 : i32
    return %c0_i32, %c0_i32_0 : i32, i32
  }
  func.func @transform_3(%arg0: i32) -> (i32, i32) {
    %c0_i32 = arith.constant 0 : i32
    %c0_i32_0 = arith.constant 0 : i32
    %c0_i32_1 = arith.constant 0 : i32
    return %c0_i32, %c0_i32_0 : i32, i32
  }
  func.func @transform_4(%arg0: i32) -> (i32, i32) {
    %c0_i32 = arith.constant 0 : i32
    %c0_i32_0 = arith.constant 0 : i32
    %c0_i32_1 = arith.constant 0 : i32
    return %c0_i32, %c0_i32_0 : i32, i32
  }
  func.func @transform_5(%arg0: i32) -> (i32, i32) {
    %c0_i32 = arith.constant 0 : i32
    %c0_i32_0 = arith.constant 0 : i32
    return %arg0, %c0_i32 : i32, i32
  }
  func.func @transform_6(%arg0: i32) -> (i32, i32) {
    %c0_i32 = arith.constant 0 : i32
    %c0_i32_0 = arith.constant 0 : i32
    return %c0_i32, %arg0 : i32, i32
  }
}

</mosaic_0001>

<bundles_post_ra>
// kernel: tpu_custom_call.1
= control target key start
LH: loop header
LB: loop body
LE: loop exit
PB: predicated region body
PF: predicated region fallthrough
CT: control target
= control target key end

     0   :  { %12 = vsyncpa [#allocation3], 0  ;;  %s522_s0 = inlined_call_operand.hbm [shape: f32[16,48], index: 0, kind: input, shape index: {}]   ;;  %s523_s1 = inlined_call_operand.hbm [shape: f32[16,48], index: 1, kind: input, shape index: {}]   ;;  %s524_s2 = inlined_call_operand.vmem [shape: f32[1,48], index: 2, kind: input, shape index: {}]   ;;  %s525_s3 = inlined_call_operand.vmem [shape: f32[1,48], index: 3, kind: input, shape index: {}]   ;;  %s526_s4 = inlined_call_operand.vmem [shape: f32[4,64], index: 4, kind: input, shape index: {}]   ;;  %s527_s5 = inlined_call_operand.hbm [shape: f32[16,32], index: 5, kind: output, shape index: {0}]   ;;  %s528_s6 = inlined_call_operand.hbm [shape: f32[4,16], index: 6, kind: output, shape index: {1}]  }
   0x1   :  { %13 = vsyncpa [#allocation6], 0 }
   0x2   :  { %14 = vsyncpa [#allocation4], 0 }
   0x3   :  { %15 = vsyncpa [#allocation9], 0  ;;  %s399_s21 = smov [#allocation2]   ;;  %s303_s25 = scalar_lea.hbm %s522_s0, 256 }
   0x4   :  { %s21_s22 = sshll.u32 %s399_s21, 4  ;;  %p304_p0 = scmp.ne.s32.totalorder %s522_s0, %s303_s25  ;;  %s22_s22 = int_to_ptr.vmem [resolvable:$true] %s21_s22 }
   0x5   :  { %p307_p1 = scmp.lt.u32.totalorder %s303_s25, %s522_s0 }
   0x7   :  { %p309_p2 = pnand %p307_p1, %p304_p0 }
   0x9   :  { %312 = shalt.err (!%p309_p2)
}
   0xa   :  { %s313_s30 = scalar_lea.vmem %s22_s22, 256  ;;  %p318_p4 = scmp.lt.s32.totalorder %s22_s22, %s22_s22 }
   0xb   :  { %p314_p3 = scmp.ne.s32.totalorder %s22_s22, %s313_s30  ;;  %p319_p5 = scmp.lt.s32.totalorder %s313_s30, %s313_s30 }
   0xd   :  { %p320_p6 = por %p319_p5, %p318_p4 }
   0xf   :  { %p321_p7 = pnand %p320_p6, %p314_p3 }
  0x11   :  { %324 = shalt.err (!%p321_p7)
}
  0x12   :  { %s400_s7 = smov 128   ;;  %s401_s8 = smov 8  }
  0x13   :  { %27 = dma.hbm_to_vmem [thread:$0]  %s522_s0, 256, %s22_s22, [#allocation3], %s400_s7, %s400_s7, %s401_s8  }
  0x14   :  { %s402_s11 = smov [#allocation5]   ;;  %s325_s15 = scalar_lea.hbm %s523_s1, 256 }
  0x15   :  { %s33_s12 = sshll.u32 %s402_s11, 4  ;;  %p326_p8 = scmp.ne.s32.totalorder %s523_s1, %s325_s15  ;;  %s34_s12 = int_to_ptr.vmem [resolvable:$true] %s33_s12 }
  0x16   :  { %p329_p9 = scmp.lt.u32.totalorder %s325_s15, %s523_s1 }
  0x18   :  { %p331_p10 = pnand %p329_p9, %p326_p8 }
  0x1a   :  { %334 = shalt.err (!%p331_p10)
}
  0x1b   :  { %s335_s20 = scalar_lea.vmem %s34_s12, 256  ;;  %p340_p12 = scmp.lt.s32.totalorder %s34_s12, %s34_s12 }
  0x1c   :  { %p336_p11 = scmp.ne.s32.totalorder %s34_s12, %s335_s20  ;;  %p341_p13 = scmp.lt.s32.totalorder %s335_s20, %s335_s20 }
  0x1e   :  { %p342_p0 = por %p341_p13, %p340_p12 }
  0x20   :  { %p343_p1 = pnand %p342_p0, %p336_p11 }
  0x22   :  { %346 = shalt.err (!%p343_p1)
}
  0x23   :  { %39 = dma.hbm_to_vmem [thread:$0]  %s523_s1, 256, %s34_s12, [#allocation6], %s400_s7, %s400_s7, %s401_s8  }
  0x24   :  { %391 = dma.done.wait [#allocation3], 256  }
  0x25   :  { %392 = vsyncadd [#allocation3], 4294967040 }
  0x26   :  { %393 = dma.done.wait [#allocation6], 256  }
  0x27   :  { %394 = vsyncadd [#allocation6], 4294967040  ;;  %v476_v0 = vld [vmem:[#allocation2] sm:$0xff]  ;;  %v54_v1 = vld [vmem:[#allocation5] sm:$0xff]  ;;  %s403_s1 = smov 112   ;;  %v405_v21 = vmov 0.0|0.0  }
  0x28   :  { %v267_v2 = vld [vmem:[%s524_s2] ss:$0 sm:$0xff]  ;;  %v484_v5 = vld [vmem:[#allocation2 + $0x8] sm:$0xff]  ;;  %v55_v6 = vld [vmem:[#allocation5 + $0x8] sm:$0xff]  ;;  %s404_s2 = smov 96   ;;  %282 = vmatprep.subr.bf16.mxu0 %v405_v21  ;;  %vm406_vm0 = vmmov 0  }
  0x29   :  { %v268_v3 = vld [vmem:[%s525_s3] ss:$0 sm:$0xff]  ;;  %v78_v4 = vmul.f32 %v267_v2, %v54_v1  ;;  %v79_v9 = vmul.f32 %v267_v2, %v55_v6  ;;  %v298_v10 = vpack.i.bf16 %v55_v6, %v54_v1  ;;  %v64_v12 = vmul.f32 %v267_v2, %v476_v0  ;;  %s408_s3 = smov 16   ;;  %s409_s28 = smov [#allocation7]  }
  0x2a   :  { %v76_v7 = vmul.f32 %v268_v3, %v476_v0  ;;  %v77_v8 = vmul.f32 %v268_v3, %v484_v5  ;;  %v72_v13 = vmul.f32 %v268_v3, %v54_v1  ;;  %v65_v15 = vmul.f32 %v267_v2, %v484_v5  ;;  %v147_v53 = vld [vmem:[%s526_s4] sm:$0xf]  ;;  %s240_s29 = sshll.u32 %s409_s28, 4  ;;  %s241_s29 = int_to_ptr.vmem [resolvable:$true] %s240_s29 }
  0x2b   :  { %v73_v16 = vmul.f32 %v268_v3, %v55_v6  ;;  %v407_v26 = vmov 0.0   ;;  %vm138_vm1 = vcmask 130048   ;;  %vm141_vm2 = vcmask 261120   ;;  %s347_s30 = scalar_lea.vmem %s241_s29, 256  ;;  %p352_p3 = scmp.lt.s32.totalorder %s241_s29, %s241_s29 }
  0x2c   :  { %v80_v11 = vadd.f32 %v78_v4, %v76_v7  ;;  %v81_v14 = vadd.f32 %v79_v9, %v77_v8  ;;  %v74_v17 = vsub.f32 %v64_v12, %v72_v13  ;;  %279 = vmatprep.mubr.msk.f32.mxu0 %vm406_vm0, %v407_v26  ;;  %vm144_vm3 = vcmask 392192   ;;  %p348_p2 = scmp.ne.s32.totalorder %s241_s29, %s347_s30  ;;  %p353_p4 = scmp.lt.s32.totalorder %s347_s30, %s347_s30 }
  0x2d   :  { %v75_v18 = vsub.f32 %v65_v15, %v73_v16  ;;  %vm148_vm4 = vcmask 523264  }
  0x2e   :  { %94 = vrot.lane.b32.xlu0 %v80_v11, %s403_s1  ;;  %110 = vrot.lane.b32.xlu1 %v80_v11, %s404_s2  ;;  %vm284_vm5 = vmpackc.low %vm148_vm4, %vm148_vm4  ;;  %p354_p5 = por %p353_p4, %p352_p3 }
  0x30   :  { %p355_p6 = pnand %p354_p5, %p348_p2 }
  0x32   :  { %96 = vrot.lane.b32.xlu0 %v81_v14, %s403_s1  ;;  %112 = vrot.lane.b32.xlu1 %v81_v14, %s404_s2 }
  0x36   :  { %84 = vrot.lane.b32.xlu0 %v74_v17, %s403_s1  ;;  %86 = vrot.lane.b32.xlu1 %v75_v18, %s403_s1 }
  0x3a   :  { %102 = vrot.lane.b32.xlu0 %v74_v17, %s404_s2  ;;  %104 = vrot.lane.b32.xlu1 %v75_v18, %s404_s2 }
  0xa0   :  { %v95_v19 = vpop.permute.xlu0 %94  ;;  %v111_v20 = vpop.permute.xlu1 %110 }
  0xa1   :  { %v100_v22 = vadd.f32 %v95_v19, %v80_v11 }
  0xa3   :  { %v116_v23 = vadd.f32 %v111_v20, %v100_v22 }
  0xa4   :  { %v97_v24 = vpop.permute.xlu0 %96  ;;  %v113_v25 = vpop.permute.xlu1 %112 }
  0xa5   :  { %v120_v27 = vmul.f32 0.33333334, %v116_v23  ;;  %v101_v28 = vadd.f32 %v97_v24, %v81_v14 }
  0xa7   :  { %v117_v29 = vadd.f32 %v113_v25, %v101_v28  ;;  %124 = vrot.lane.b32.xlu0 %v120_v27, %s408_s3 }
  0xa8   :  { %v85_v31 = vpop.permute.xlu0 %84  ;;  %v87_v32 = vpop.permute.xlu1 %86 }
  0xa9   :  { %v121_v30 = vmul.f32 0.33333334, %v117_v29  ;;  %v90_v33 = vadd.f32 %v85_v31, %v74_v17  ;;  %v91_v35 = vadd.f32 %v87_v32, %v75_v18 }
  0xab   :  { %126 = vrot.lane.b32.xlu1 %v121_v30, %s408_s3  ;;  %299 = vrot.lane.b32.xlu0 %v298_v10, %s408_s3 }
  0xac   :  { %v103_v34 = vpop.permute.xlu0 %102  ;;  %v105_v37 = vpop.permute.xlu1 %104 }
  0xad   :  { %v108_v36 = vadd.f32 %v103_v34, %v90_v33  ;;  %v109_v39 = vadd.f32 %v105_v37, %v91_v35 }
  0xaf   :  { %v118_v38 = vmul.f32 0.33333334, %v108_v36  ;;  %v119_v42 = vmul.f32 0.33333334, %v109_v39 }
 0x119   :  { %v125_v40 = vpop.permute.xlu0 %124 }
 0x11a   :  { %v139_v41 = vsel %vm138_vm1, %v118_v38, %v125_v40 }
 0x11b   :  { %233 = vst.msk [vmem:[#allocation7] sm:$0xff] %vm141_vm2, %v139_v41  ;;  %v142_v48 = vsel %vm141_vm2, %v139_v41, %v476_v0 }
 0x11d   :  { %v127_v43 = vpop.permute.xlu1 %126  ;;  %v300_v44 = vpop.permute.xlu0 %299 }
 0x11e   :  { %v140_v45 = vsel %vm138_vm1, %v119_v42, %v127_v43  ;;  %v302_v46 = vunpack.i.h.bf16 %v300_v44  ;;  %v301_v47 = vunpack.i.l.bf16 %v300_v44 }
 0x11f   :  { %v143_v49 = vsel %vm141_vm2, %v140_v45, %v484_v5  ;;  %234 = vst.msk [vmem:[#allocation7 + $0x8] sm:$0xff] %vm141_vm2, %v140_v45 }
 0x120   :  { %v145_v50 = vsel %vm144_vm3, %v142_v48, %v301_v47  ;;  %v146_v51 = vsel %vm144_vm3, %v143_v49, %v302_v46 }
 0x121   :  { %v283_v52 = vpack.c.bf16 %v146_v51, %v145_v50 }
 0x123   :  { %285 = vmatpush3.bf16.xpose.msk.msra.mxu0 %vm284_vm5, %v283_v52 }
 0x12a   :  { %280 = vmatmul.mubr.msk.f32.vlgmr.msra.gmra.mrb[0].mxu0 %vm148_vm4, %v147_v53 }
 0x12b   :  { %358 = shalt.err (!%p355_p6)
}
 0x12c   :  { %s359_s11 = scalar_lea.hbm %s527_s5, 256 }
 0x12d   :  { %p360_p7 = scmp.ne.s32.totalorder %s527_s5, %s359_s11  ;;  %p363_p8 = scmp.lt.u32.totalorder %s359_s11, %s527_s5 }
 0x12f   :  { %p365_p9 = pnand %p363_p8, %p360_p7 }
 0x131   :  { %368 = shalt.err (!%p365_p9)
}
 0x132   :  { %246 = dma.vmem_to_hbm [thread:$0]  %s241_s29, 256, %s527_s5, [#allocation4], %s400_s7, %s400_s7, %s401_s8   ;;  %vm231_vm7 = vcmask 125952  }
 0x133   :  { %s410_s17 = smov [#allocation8]  }
 0x134   :  { %s253_s18 = sshll.u32 %s410_s17, 4  ;;  %s254_s18 = int_to_ptr.vmem [resolvable:$true] %s253_s18 }
 0x135   :  { %s369_s19 = scalar_lea.vmem %s254_s18, 64  ;;  %p374_p11 = scmp.lt.s32.totalorder %s254_s18, %s254_s18 }
 0x136   :  { %p370_p10 = scmp.ne.s32.totalorder %s254_s18, %s369_s19  ;;  %p375_p12 = scmp.lt.s32.totalorder %s369_s19, %s369_s19 }
 0x138   :  { %p376_p13 = por %p375_p12, %p374_p11 }
 0x13a   :  { %p377_p0 = pnand %p376_p13, %p370_p10 }
 0x1fd   :  { %v224_v54 = vpop.f32.mrb[0].mxu0 }
 0x1fe   :  { %vm228_vm6 = vcmp.gt.f32.partialorder %v224_v54, 0.0  ;;  %v229_v55 = vmul.f32 0.01, %v224_v54  ;;  %v281_v56 = vpop.f32.mrb[1].mxu0 }
 0x200   :  { %v230_v57 = vsel %vm228_vm6, %v224_v54, %v229_v55 }
 0x201   :  { %232 = vst.msk [vmem:[#allocation8] sm:$0xf] %vm231_vm7, %v230_v57 }
 0x202   :  { %380 = shalt.err (!%p377_p0)
}
 0x203   :  { %s381_s5 = scalar_lea.hbm %s528_s6, 64 }
 0x204   :  { %p382_p1 = scmp.ne.s32.totalorder %s528_s6, %s381_s5  ;;  %p385_p2 = scmp.lt.u32.totalorder %s381_s5, %s528_s6 }
 0x206   :  { %p387_p3 = pnand %p385_p2, %p382_p1 }
 0x208   :  { %390 = shalt.err (!%p387_p3)
}
 0x209   :  { %256 = dma.vmem_to_hbm [thread:$0]  %s254_s18, 64, %s528_s6, [#allocation9]  }
 0x20a   :  { %395 = dma.done.wait [#allocation4], 256  }
 0x20b   :  { %396 = vsyncadd [#allocation4], 4294967040 }
 0x20c   :  { %397 = dma.done.wait [#allocation9], 64  }
 0x20d   :  { %398 = vsyncadd [#allocation9], 4294967232 }
 0x20e   :  { %263 = vsyncpa [#allocation3], 1 }
 0x20f   :  { %264 = vsyncpa [#allocation6], 1 }
 0x210   :  { %265 = vsyncpa [#allocation4], 1 }
 0x211   :  { %266 = vsyncpa [#allocation9], 1 }

</bundles_post_ra>
